<compile_context>
chip_gen: v7x
topology: tpu7x:2x2x1
jax: 0.10.0
libtpu: 0.0.40
codegen_flags: <defaults>
</compile_context>

<pallas_src>
import math
import numpy as np
import jax
import jax.numpy as jnp
from jax.experimental import pallas as pl
from jax.experimental.pallas import tpu as pltpu


# ----------------------------- helpers -------------------------------------------

def _round_up(x, m):
    return ((x + m - 1) // m) * m


def _cdiv(a, b):
    return (a + b - 1) // b


def linear_space(backcast_length, forecast_length, is_forecast=True):
    horizon = forecast_length if is_forecast else backcast_length
    return np.arange(0, horizon) / horizon


def seasonality_basis(thetas_dim, t):
    """S = cat([cos(2*pi*i*t) for i<p1], [sin(2*pi*i*t) for i<p2]), shape (p, len(t))."""
    p = thetas_dim
    p1, p2 = (p // 2, p // 2) if p % 2 == 0 else (p // 2, p // 2 + 1)
    s1 = np.array([np.cos(2 * np.pi * i * t) for i in range(p1)])
    s2 = np.array([np.sin(2 * np.pi * i * t) for i in range(p2)])
    return np.concatenate([s1, s2], axis=0).astype(np.float32)


def squeeze_last_dim(x):
    if x.ndim == 3 and x.shape[-1] == 1:
        return x[..., 0]
    return x


# ----------------------------- Pallas kernel -------------------------------------

def _make_kernel(L, U, OUT):
    """Kernel over one batch tile.

    x_ref : (tile_b, L)            input rows (unpadded K = backcast_length)
    a_ref : (L + 4, U)             rows [0:L] = W1, rows [L:L+4] = b1..b4
    w_ref : (U, 3*U + OUT)         [W2 | W3 | W4 | s_cat]
    o_ref : (tile_b, OUT)          [backcast (cols 0:L) | forecast (cols L:L+F)]
    """
    def kernel(x_ref, a_ref, w_ref, o_ref):
        cdt = w_ref.dtype                      # compute dtype of the MXU operands
        f32 = jnp.float32
        x = x_ref[...].astype(cdt)
        w1 = a_ref[0:L, :]
        b1 = a_ref[L + 0:L + 1, :]
        b2 = a_ref[L + 1:L + 2, :]
        b3 = a_ref[L + 2:L + 3, :]
        b4 = a_ref[L + 3:L + 4, :]
        # 4x Linear+ReLU trunk (MXU matmuls, f32 accumulation)
        h = jnp.maximum(jnp.dot(x, w1, preferred_element_type=f32) + b1, 0.0)
        h = jnp.maximum(jnp.dot(h.astype(cdt), w_ref[:, 0 * U:1 * U],
                                preferred_element_type=f32) + b2, 0.0)
        h = jnp.maximum(jnp.dot(h.astype(cdt), w_ref[:, 1 * U:2 * U],
                                preferred_element_type=f32) + b3, 0.0)
        h = jnp.maximum(jnp.dot(h.astype(cdt), w_ref[:, 2 * U:3 * U],
                                preferred_element_type=f32) + b4, 0.0)
        # theta projection folded into the basis: single 128-lane matmul producing
        # [backcast | forecast] as one lane-dense output slab.
        o_ref[...] = jnp.dot(h.astype(cdt), w_ref[:, 3 * U:3 * U + OUT],
                             preferred_element_type=f32).astype(o_ref.dtype)
    return kernel


# ----------------------------- module wrapper -------------------------------------

class SeasonalityBlockPallas:
    """Holds packed, device-resident constants; forward path is jitted."""

    def __init__(self, params, backcast_length, forecast_length, thetas_dim,
                 param_dtype=jnp.float32, max_tile_b=1024, core_split_b=512):
        self.backcast_length = backcast_length
        self.forecast_length = forecast_length
        self.thetas_dim = thetas_dim
        self.max_tile_b = max_tile_b
        self.core_split_b = core_split_b

        L, F, T = backcast_length, forecast_length, thetas_dim
        U = params["w1"].shape[1]                      # units
        Up = _round_up(U, 128)
        OUT = _round_up(L + F, 128)                    # = 128 here (L+F = 15)
        self.Up, self.OUT = Up, OUT

        # Fold the (bias-free, shared) theta projection into the basis matrices:
        #   backcast = (h @ wt) @ S_b == h @ (wt @ S_b),  same for forecast.
        S_b = seasonality_basis(T, linear_space(L, F, is_forecast=False))   # (T, L)
        S_f = seasonality_basis(T, linear_space(L, F, is_forecast=True))    # (T, F)
        wt = np.asarray(params["wt"], np.float32)                           # (U, T)
        s_cat = np.zeros((Up, OUT), np.float32)
        s_cat[:U, :L] = wt @ S_b                       # backcast columns [0:L]
        s_cat[:U, L:L + F] = wt @ S_f                  # forecast columns [L:L+F]

        def padw(w):
            out = np.zeros((Up, Up), np.float32)
            out[:w.shape[0], :w.shape[1]] = np.asarray(w, np.float32)
            return out

        # slab_a: W1 rows + the 4 biases stacked below.
        slab_a = np.zeros((L + 4, Up), np.float32)
        slab_a[:L, :U] = np.asarray(params["w1"], np.float32)
        for r, name in enumerate(("b1", "b2", "b3", "b4")):
            slab_a[L + r, :U] = np.asarray(params[name], np.float32)

        # slab_w: [W2 | W3 | W4 | s_cat] along the lane axis.
        slab_w = np.concatenate(
            [padw(params["w2"]), padw(params["w3"]), padw(params["w4"]), s_cat],
            axis=1)

        # Uploaded to device exactly once.
        self.slab_a = jnp.asarray(slab_a, dtype=param_dtype)
        self.slab_w = jnp.asarray(slab_w, dtype=param_dtype)

        self._kernel = _make_kernel(L, Up, OUT)
        self._forward = jax.jit(self._forward_impl)

    def _tiling(self, B):
        # Small/medium batches: one fat tile (v5e/v6e have a single TensorCore and
        # ~0.35us fixed cost per grid step).  Large batches: >=2 even steps so the
        # "parallel" batch axis can shard across v7x's 2 TensorCores.
        if B <= self.max_tile_b and B < 2 * self.core_split_b:
            return B, 1
        tile_b = min(self.max_tile_b, max(8, _round_up(_cdiv(B, 2), 8)))
        return tile_b, _cdiv(B, tile_b)

    def _forward_impl(self, x):
        x = squeeze_last_dim(x).astype(jnp.float32)
        B, L = x.shape
        Up, OUT = self.Up, self.OUT
        tile_b, grid_b = self._tiling(B)

        # NOTE: constants use index_map -> (0, 0) so they stay VMEM-resident across
        # grid steps (no re-fetch).  Footprint is tiny, so default double-buffering
        # is left alone (pl.Buffered(1) would save ~0.3 MiB, not worth the risk).
        out = pl.pallas_call(
            self._kernel,
            out_shape=jax.ShapeDtypeStruct((B, OUT), jnp.float32),
            grid=(grid_b,),
            in_specs=[
                pl.BlockSpec((tile_b, L), lambda i: (i, 0)),
                pl.BlockSpec(self.slab_a.shape, lambda i: (0, 0)),
                pl.BlockSpec(self.slab_w.shape, lambda i: (0, 0)),
            ],
            out_specs=pl.BlockSpec((tile_b, OUT), lambda i: (i, 0)),
            compiler_params=pltpu.CompilerParams(
                dimension_semantics=("parallel",)),
        )(x, self.slab_a, self.slab_w)

        backcast = out[:, :L]
        forecast = out[:, L:L + self.forecast_length]
        return backcast, forecast

    def __call__(self, x):
        return self._forward(x)


# ----------------------------- deterministic parameter init ----------------------

def init_params(key, backcast_length, units, thetas_dim):
    def uniform(key, shape, fan_in):
        bound = 1.0 / math.sqrt(fan_in)
        return jax.random.uniform(key, shape, jnp.float32, -bound, bound)

    ks = jax.random.split(key, 9)
    params = {
        # weights stored as (in_features, out_features)
        "w1": uniform(ks[0], (backcast_length, units), backcast_length),
        "b1": uniform(ks[1], (units,), backcast_length),
        "w2": uniform(ks[2], (units, units), units),
        "b2": uniform(ks[3], (units,), units),
        "w3": uniform(ks[4], (units, units), units),
        "b3": uniform(ks[5], (units,), units),
        "w4": uniform(ks[6], (units, units), units),
        "b4": uniform(ks[7], (units,), units),
        # shared theta projection (share_thetas=True), no bias
        "wt": uniform(ks[8], (units, thetas_dim), units),
    }
    return jax.tree_util.tree_map(np.asarray, params)


# ----------------------------- reference (pure numpy) -----------------------------

def reference_forward(x, params, backcast_length, forecast_length, thetas_dim):
    x = squeeze_last_dim(np.asarray(x, dtype=np.float32))
    h = np.maximum(x @ params["w1"] + params["b1"], 0.0)
    h = np.maximum(h @ params["w2"] + params["b2"], 0.0)
    h = np.maximum(h @ params["w3"] + params["b3"], 0.0)
    h = np.maximum(h @ params["w4"] + params["b4"], 0.0)
    theta = h @ params["wt"]
    S_b = seasonality_basis(thetas_dim, linear_space(backcast_length, forecast_length, False))
    S_f = seasonality_basis(thetas_dim, linear_space(backcast_length, forecast_length, True))
    return theta @ S_b, theta @ S_f


# ----------------------------- main ------------------------------------------------

if __name__ == "__main__":
    batch = 2
    backcast_length = 10
    forecast_length = 5
    units = 32
    nb_harmonics = None
    thetas_dim = nb_harmonics if nb_harmonics else forecast_length  # = 5

    key = jax.random.PRNGKey(0)
    k_x, k_p = jax.random.split(key)
    x = jax.random.normal(k_x, (batch, backcast_length, 1), dtype=jnp.float32)
    params = init_params(k_p, backcast_length, units, thetas_dim)

    ref_b, ref_f = reference_forward(np.asarray(x), params,
                                     backcast_length, forecast_length, thetas_dim)

    # --- f32 path: matches the numpy reference to tight tolerance -----------------
    block = SeasonalityBlockPallas(params, backcast_length, forecast_length, thetas_dim)
    backcast, forecast = block(x)
    backcast = jax.block_until_ready(backcast)
    forecast = jax.block_until_ready(forecast)

    assert backcast.shape == (batch, backcast_length)
    assert forecast.shape == (batch, forecast_length)
    np.testing.assert_allclose(np.asarray(backcast), ref_b, rtol=1e-5, atol=1e-5)
    np.testing.assert_allclose(np.asarray(forecast), ref_f, rtol=1e-5, atol=1e-5)

    # second call exercises the cached jit path (no host re-packing / re-upload)
    backcast2, forecast2 = block(x)
    jax.block_until_ready(backcast2)
    np.testing.assert_allclose(np.asarray(backcast2), ref_b, rtol=1e-5, atol=1e-5)

    # --- bf16 weights path (MXU-native); looser tolerance --------------------------
    block_bf16 = SeasonalityBlockPallas(params, backcast_length, forecast_length,
                                        thetas_dim, param_dtype=jnp.bfloat16)
    bb, fb = block_bf16(x)
    bb = jax.block_until_ready(bb)
    fb = jax.block_until_ready(fb)
    np.testing.assert_allclose(np.asarray(bb), ref_b, rtol=5e-2, atol=5e-2)
    np.testing.assert_allclose(np.asarray(fb), ref_f, rtol=5e-2, atol=5e-2)

    print("KERNEL_OK")
</pallas_src>

<mosaic_0001>
module attributes {stable_mosaic.version = 11 : i64} {
  func.func @kernel(%arg0: i32, %arg1: memref<2x10xf32, #tpu.memory_space<vmem>>, %arg2: memref<14x128xf32, #tpu.memory_space<vmem>>, %arg3: memref<128x512xf32, #tpu.memory_space<vmem>>, %arg4: memref<2x128xf32, #tpu.memory_space<vmem>>) attributes {dimension_semantics = [#tpu.dimension_semantics<parallel>], iteration_bounds = array<i64: 1>, scalar_prefetch = 0 : i64, scratch_operands = 0 : i64, tpu.core_type = #tpu.core_type<tc>, window_params = [{transform_indices = @transform_0, window_bounds = array<i64: 2, 10>}, {pipeline_mode = #tpu.pipeline_mode<synchronous>, transform_indices = @transform_1, window_bounds = array<i64: 14, 128>}, {pipeline_mode = #tpu.pipeline_mode<synchronous>, transform_indices = @transform_2, window_bounds = array<i64: 128, 512>}, {transform_indices = @transform_3, window_bounds = array<i64: 2, 128>}]} {
    %c0 = arith.constant 0 : index
    %c0_0 = arith.constant 0 : index
    %0 = vector.load %arg1[%c0, %c0_0] : memref<2x10xf32, #tpu.memory_space<vmem>>, vector<2x10xf32>
    %c0_1 = arith.constant 0 : index
    %c0_2 = arith.constant 0 : index
    %1 = vector.load %arg2[%c0_1, %c0_2] : memref<14x128xf32, #tpu.memory_space<vmem>>, vector<10x128xf32>
    %c10 = arith.constant 10 : index
    %c0_3 = arith.constant 0 : index
    %2 = vector.load %arg2[%c10, %c0_3] : memref<14x128xf32, #tpu.memory_space<vmem>>, vector<1x128xf32>
    %c11 = arith.constant 11 : index
    %c0_4 = arith.constant 0 : index
    %3 = vector.load %arg2[%c11, %c0_4] : memref<14x128xf32, #tpu.memory_space<vmem>>, vector<1x128xf32>
    %c12 = arith.constant 12 : index
    %c0_5 = arith.constant 0 : index
    %4 = vector.load %arg2[%c12, %c0_5] : memref<14x128xf32, #tpu.memory_space<vmem>>, vector<1x128xf32>
    %c13 = arith.constant 13 : index
    %c0_6 = arith.constant 0 : index
    %5 = vector.load %arg2[%c13, %c0_6] : memref<14x128xf32, #tpu.memory_space<vmem>>, vector<1x128xf32>
    %cst = arith.constant dense<0.000000e+00> : vector<2x128xf32>
    %6 = tpu.matmul %0, %1, %cst {dimension_numbers = #tpu.dot_dimension_numbers<[1], [0], [0], [1], [0, 0, 1, 1], [], []>} : vector<2x10xf32>, vector<10x128xf32>, vector<2x128xf32> -> vector<2x128xf32>
    %7 = vector.broadcast %2 : vector<1x128xf32> to vector<2x128xf32>
    %8 = arith.addf %6, %7 : vector<2x128xf32>
    %cst_7 = arith.constant 0.000000e+00 : f32
    %9 = vector.broadcast %cst_7 : f32 to vector<2x128xf32>
    %10 = arith.maximumf %8, %9 : vector<2x128xf32>
    %c0_8 = arith.constant 0 : index
    %c0_9 = arith.constant 0 : index
    %11 = vector.load %arg3[%c0_8, %c0_9] : memref<128x512xf32, #tpu.memory_space<vmem>>, vector<128x128xf32>
    %cst_10 = arith.constant dense<0.000000e+00> : vector<2x128xf32>
    %12 = tpu.matmul %10, %11, %cst_10 {dimension_numbers = #tpu.dot_dimension_numbers<[1], [0], [0], [1], [0, 0, 1, 1], [], []>} : vector<2x128xf32>, vector<128x128xf32>, vector<2x128xf32> -> vector<2x128xf32>
    %13 = vector.broadcast %3 : vector<1x128xf32> to vector<2x128xf32>
    %14 = arith.addf %12, %13 : vector<2x128xf32>
    %cst_11 = arith.constant 0.000000e+00 : f32
    %15 = vector.broadcast %cst_11 : f32 to vector<2x128xf32>
    %16 = arith.maximumf %14, %15 : vector<2x128xf32>
    %c0_12 = arith.constant 0 : index
    %c128 = arith.constant 128 : index
    %17 = vector.load %arg3[%c0_12, %c128] : memref<128x512xf32, #tpu.memory_space<vmem>>, vector<128x128xf32>
    %cst_13 = arith.constant dense<0.000000e+00> : vector<2x128xf32>
    %18 = tpu.matmul %16, %17, %cst_13 {dimension_numbers = #tpu.dot_dimension_numbers<[1], [0], [0], [1], [0, 0, 1, 1], [], []>} : vector<2x128xf32>, vector<128x128xf32>, vector<2x128xf32> -> vector<2x128xf32>
    %19 = vector.broadcast %4 : vector<1x128xf32> to vector<2x128xf32>
    %20 = arith.addf %18, %19 : vector<2x128xf32>
    %cst_14 = arith.constant 0.000000e+00 : f32
    %21 = vector.broadcast %cst_14 : f32 to vector<2x128xf32>
    %22 = arith.maximumf %20, %21 : vector<2x128xf32>
    %c0_15 = arith.constant 0 : index
    %c256 = arith.constant 256 : index
    %23 = vector.load %arg3[%c0_15, %c256] : memref<128x512xf32, #tpu.memory_space<vmem>>, vector<128x128xf32>
    %cst_16 = arith.constant dense<0.000000e+00> : vector<2x128xf32>
    %24 = tpu.matmul %22, %23, %cst_16 {dimension_numbers = #tpu.dot_dimension_numbers<[1], [0], [0], [1], [0, 0, 1, 1], [], []>} : vector<2x128xf32>, vector<128x128xf32>, vector<2x128xf32> -> vector<2x128xf32>
    %25 = vector.broadcast %5 : vector<1x128xf32> to vector<2x128xf32>
    %26 = arith.addf %24, %25 : vector<2x128xf32>
    %cst_17 = arith.constant 0.000000e+00 : f32
    %27 = vector.broadcast %cst_17 : f32 to vector<2x128xf32>
    %28 = arith.maximumf %26, %27 : vector<2x128xf32>
    %c0_18 = arith.constant 0 : index
    %c384 = arith.constant 384 : index
    %29 = vector.load %arg3[%c0_18, %c384] : memref<128x512xf32, #tpu.memory_space<vmem>>, vector<128x128xf32>
    %cst_19 = arith.constant dense<0.000000e+00> : vector<2x128xf32>
    %30 = tpu.matmul %28, %29, %cst_19 {dimension_numbers = #tpu.dot_dimension_numbers<[1], [0], [0], [1], [0, 0, 1, 1], [], []>} : vector<2x128xf32>, vector<128x128xf32>, vector<2x128xf32> -> vector<2x128xf32>
    %c0_20 = arith.constant 0 : index
    %c0_21 = arith.constant 0 : index
    %31 = vector.load %arg4[%c0_20, %c0_21] : memref<2x128xf32, #tpu.memory_space<vmem>>, vector<2x128xf32>
    tpu.vector_store %arg4[%c0_20, %c0_21], %30 {strides = array<i32>} : memref<2x128xf32, #tpu.memory_space<vmem>>, vector<2x128xf32>,
    return
  }
  func.func @transform_0(%arg0: i32) -> (i32, i32) {
    %c0_i32 = arith.constant 0 : i32
    %c0_i32_0 = arith.constant 0 : i32
    return %arg0, %c0_i32 : i32, i32
  }
  func.func @transform_1(%arg0: i32) -> (i32, i32) {
    %c0_i32 = arith.constant 0 : i32
    %c0_i32_0 = arith.constant 0 : i32
    %c0_i32_1 = arith.constant 0 : i32
    return %c0_i32, %c0_i32_0 : i32, i32
  }
  func.func @transform_2(%arg0: i32) -> (i32, i32) {
    %c0_i32 = arith.constant 0 : i32
    %c0_i32_0 = arith.constant 0 : i32
    %c0_i32_1 = arith.constant 0 : i32
    return %c0_i32, %c0_i32_0 : i32, i32
  }
  func.func @transform_3(%arg0: i32) -> (i32, i32) {
    %c0_i32 = arith.constant 0 : i32
    %c0_i32_0 = arith.constant 0 : i32
    return %arg0, %c0_i32 : i32, i32
  }
}

</mosaic_0001>

<bundles_post_ra>
// kernel: _forward_impl.1
= control target key start
LH: loop header
LB: loop body
LE: loop exit
PB: predicated region body
PF: predicated region fallthrough
CT: control target
= control target key end

     0   :  { %8 = vsyncpa [#allocation3], 0  ;;  %s983_s0 = inlined_call_operand.vmem [shape: f32[2,10], index: 0, kind: input, shape index: {}]   ;;  %s984_s1 = inlined_call_operand.hbm [shape: f32[14,128], index: 1, kind: input, shape index: {}]   ;;  %s985_s2 = inlined_call_operand.hbm [shape: f32[128,512], index: 2, kind: input, shape index: {}]   ;;  %s986_s3 = inlined_call_operand.vmem [shape: f32[2,128], index: 3, kind: output, shape index: {}]  }
   0x1   :  { %9 = vsyncpa [#allocation5], 0  ;;  %s880_s12 = smov [#allocation2]   ;;  %s832_s16 = scalar_lea.hbm %s984_s1, 256 }
   0x2   :  { %s17_s13 = sshll.u32 %s880_s12, 4  ;;  %p833_p0 = scmp.ne.s32.totalorder %s984_s1, %s832_s16  ;;  %s18_s13 = int_to_ptr.vmem [resolvable:$true] %s17_s13 }
   0x3   :  { %p836_p1 = scmp.lt.u32.totalorder %s832_s16, %s984_s1 }
   0x5   :  { %p838_p2 = pnand %p836_p1, %p833_p0 }
   0x7   :  { %841 = shalt.err (!%p838_p2)
}
   0x8   :  { %s842_s21 = scalar_lea.vmem %s18_s13, 256  ;;  %p847_p4 = scmp.lt.s32.totalorder %s18_s13, %s18_s13 }
   0x9   :  { %p843_p3 = scmp.ne.s32.totalorder %s18_s13, %s842_s21  ;;  %p848_p5 = scmp.lt.s32.totalorder %s842_s21, %s842_s21 }
   0xb   :  { %p849_p6 = por %p848_p5, %p847_p4 }
   0xd   :  { %p850_p7 = pnand %p849_p6, %p843_p3 }
   0xf   :  { %853 = shalt.err (!%p850_p7)
}
  0x10   :  { %s881_s22 = smov 128   ;;  %s882_s23 = smov 8  }
  0x11   :  { %23 = dma.hbm_to_vmem [thread:$0]  %s984_s1, 256, %s18_s13, [#allocation3], %s881_s22, %s881_s22, %s882_s23  }
  0x12   :  { %s883_s26 = smov [#allocation4]   ;;  %s854_s30 = scalar_lea.hbm %s985_s2, 8192 }
  0x13   :  { %s29_s27 = sshll.u32 %s883_s26, 4  ;;  %p855_p8 = scmp.ne.s32.totalorder %s985_s2, %s854_s30  ;;  %s30_s27 = int_to_ptr.vmem [resolvable:$true] %s29_s27 }
  0x14   :  { %p858_p9 = scmp.lt.u32.totalorder %s854_s30, %s985_s2 }
  0x16   :  { %p860_p10 = pnand %p858_p9, %p855_p8 }
  0x18   :  { %863 = shalt.err (!%p860_p10)
}
  0x19   :  { %s864_s8 = scalar_lea.vmem %s30_s27, 8192  ;;  %p869_p12 = scmp.lt.s32.totalorder %s30_s27, %s30_s27 }
  0x1a   :  { %p865_p11 = scmp.ne.s32.totalorder %s30_s27, %s864_s8  ;;  %p870_p13 = scmp.lt.s32.totalorder %s864_s8, %s864_s8 }
  0x1c   :  { %p871_p0 = por %p870_p13, %p869_p12 }
  0x1e   :  { %p872_p1 = pnand %p871_p0, %p865_p11 }
  0x20   :  { %875 = shalt.err (!%p872_p1)
}
  0x21   :  { %s884_s1 = smov 512   ;;  %s885_s9 = smov 32  }
  0x22   :  { %35 = dma.hbm_to_vmem [thread:$0]  %s985_s2, 8192, %s30_s27, [#allocation5], %s884_s1, %s884_s1, %s885_s9  }
  0x23   :  { %876 = dma.done.wait [#allocation3], 256  }
  0x24   :  { %877 = vsyncadd [#allocation3], 4294967040 }
  0x25   :  { %878 = dma.done.wait [#allocation5], 8192  }
  0x26   :  { %879 = vsyncadd [#allocation5], 4294959104  ;;  %v886_v0 = vmov 0.0|0.0   ;;  %vm887_vm0 = vmmov 0   ;;  %v888_v1 = vmov 0.0   ;;  %vm57_vm1 = vcmask 1041408  }
  0x27   :  { %722 = vmatprep.subr.bf16.mxu0 %v886_v0  ;;  %726 = vmatprep.subr.bf16.mxu1 %v886_v0  ;;  %v43_v2 = vld [vmem:[#allocation2] sm:$0xff]  ;;  %v44_v3 = vld [vmem:[#allocation2 + $0x8] sm:$0x3]  ;;  %vm889_vm2 = vmmov 1   ;;  %v132_v5 = vld [vmem:[#allocation4] sm:$0xff]  ;;  %vm53_vm4 = vcmask 80896  }
  0x28   :  { %579 = vmatprep.mubr.msk.f32.mxu0 %vm887_vm0, %v888_v1  ;;  %614 = vmatprep.mubr.msk.f32.mxu1 %vm887_vm0, %v888_v1  ;;  %vm724_vm3 = vmpackc.low %vm57_vm1, %vm889_vm2  ;;  %v723_v4 = vpack.c.bf16 %v44_v3, %v43_v2  ;;  %v133_v6 = vld [vmem:[#allocation4 + $0x20] sm:$0xff]  ;;  %v42_v10 = vld [vmem:[%s983_s0] sm:$0x3] }
  0x29   :  { %v134_v7 = vld [vmem:[#allocation4 + $0x40] sm:$0xff]  ;;  %v727_v8 = vpack.c.bf16 %v133_v6, %v132_v5  ;;  %v223_v30 = vld [vmem:[#allocation4 + $0x8] sm:$0xff]  ;;  %v498_v51 = vld [vmem:[#allocation2 + $0xa] ss:$0 sm:$0xff] }
  0x2a   :  { %v135_v9 = vld [vmem:[#allocation4 + $0x60] sm:$0xff]  ;;  %725 = vmatpush3.bf16.msk.msra.mxu0 %vm724_vm3, %v723_v4  ;;  %v224_v31 = vld [vmem:[#allocation4 + $0x28] sm:$0xff]  ;;  %v314_v59 = vld [vmem:[#allocation4 + $0x10] sm:$0xff] }
  0x2b   :  { %728 = vmatpush3.bf16.msra.mxu1 %v727_v8  ;;  %v730_v11 = vpack.c.bf16 %v135_v9, %v134_v7  ;;  %750 = vmatprep.subr.bf16.mxu0 %v886_v0  ;;  %v136_v12 = vld [vmem:[#allocation4 + $0x80] sm:$0xff]  ;;  %v225_v32 = vld [vmem:[#allocation4 + $0x48] sm:$0xff]  ;;  %v751_v33 = vpack.c.bf16 %v224_v31, %v223_v30  ;;  %v315_v60 = vld [vmem:[#allocation4 + $0x30] sm:$0xff] }
  0x2c   :  { %729 = vmatprep.subr.bf16.mxu1 %v886_v0  ;;  %v137_v13 = vld [vmem:[#allocation4 + $0xa0] sm:$0xff]  ;;  %v226_v34 = vld [vmem:[#allocation4 + $0x68] sm:$0xff]  ;;  %v316_v61 = vld [vmem:[#allocation4 + $0x50] sm:$0xff]  ;;  %v775_v62 = vpack.c.bf16 %v315_v60, %v314_v59 }
  0x2d   :  { %580 = vmatmul.mubr.msk.f32.vlgmr.msra.gmra.mrb[0].mxu0 %vm53_vm4, %v42_v10  ;;  %v733_v14 = vpack.c.bf16 %v137_v13, %v136_v12  ;;  %v138_v15 = vld [vmem:[#allocation4 + $0xc0] sm:$0xff]  ;;  %v754_v35 = vpack.c.bf16 %v226_v34, %v225_v32  ;;  %v227_v36 = vld [vmem:[#allocation4 + $0x88] sm:$0xff]  ;;  %v317_v63 = vld [vmem:[#allocation4 + $0x70] sm:$0xff] }
  0x2e   :  { %649 = vmatprep.mubr.msk.f32.mxu0 %vm887_vm0, %v888_v1  ;;  %v139_v16 = vld [vmem:[#allocation4 + $0xe0] sm:$0xff]  ;;  %752 = vmatpush3.bf16.msra.mxu0 %v751_v33  ;;  %v228_v37 = vld [vmem:[#allocation4 + $0xa8] sm:$0xff]  ;;  %v778_v2 = vpack.c.bf16 %v317_v63, %v316_v61  ;;  %v318_v3 = vld [vmem:[#allocation4 + $0x90] sm:$0xff] }
  0x2f   :  { %731 = vmatpush3.bf16.msra.mxu1 %v730_v11  ;;  %v736_v17 = vpack.c.bf16 %v139_v16, %v138_v15  ;;  %v140_v18 = vld [vmem:[#allocation4 + $0x100] sm:$0xff]  ;;  %753 = vmatprep.subr.bf16.mxu0 %v886_v0  ;;  %v757_v38 = vpack.c.bf16 %v228_v37, %v227_v36  ;;  %v229_v39 = vld [vmem:[#allocation4 + $0xc8] sm:$0xff]  ;;  %v319_v4 = vld [vmem:[#allocation4 + $0xb0] sm:$0xff] }
  0x30   :  { %732 = vmatprep.subr.bf16.mxu1 %v886_v0  ;;  %v141_v19 = vld [vmem:[#allocation4 + $0x120] sm:$0xff]  ;;  %v230_v40 = vld [vmem:[#allocation4 + $0xe8] sm:$0xff]  ;;  %v781_v5 = vpack.c.bf16 %v319_v4, %v318_v3  ;;  %v320_v6 = vld [vmem:[#allocation4 + $0xd0] sm:$0xff] }
  0x31   :  { %v739_v20 = vpack.c.bf16 %v141_v19, %v140_v18  ;;  %v142_v21 = vld [vmem:[#allocation4 + $0x140] sm:$0xff]  ;;  %v760_v41 = vpack.c.bf16 %v230_v40, %v229_v39  ;;  %v231_v42 = vld [vmem:[#allocation4 + $0x108] sm:$0xff]  ;;  %v321_v7 = vld [vmem:[#allocation4 + $0xf0] sm:$0xff] }
  0x32   :  { %v143_v22 = vld [vmem:[#allocation4 + $0x160] sm:$0xff]  ;;  %755 = vmatpush3.bf16.msra.mxu0 %v754_v35  ;;  %v232_v43 = vld [vmem:[#allocation4 + $0x128] sm:$0xff]  ;;  %v784_v8 = vpack.c.bf16 %v321_v7, %v320_v6  ;;  %v322_v9 = vld [vmem:[#allocation4 + $0x110] sm:$0xff] }
  0x33   :  { %734 = vmatpush3.bf16.msra.mxu1 %v733_v14  ;;  %v742_v23 = vpack.c.bf16 %v143_v22, %v142_v21  ;;  %v144_v24 = vld [vmem:[#allocation4 + $0x180] sm:$0xff]  ;;  %756 = vmatprep.subr.bf16.mxu0 %v886_v0  ;;  %v763_v44 = vpack.c.bf16 %v232_v43, %v231_v42  ;;  %v233_v45 = vld [vmem:[#allocation4 + $0x148] sm:$0xff]  ;;  %v323_v10 = vld [vmem:[#allocation4 + $0x130] sm:$0xff] }
  0x34   :  { %735 = vmatprep.subr.bf16.mxu1 %v886_v0  ;;  %v145_v25 = vld [vmem:[#allocation4 + $0x1a0] sm:$0xff]  ;;  %v234_v46 = vld [vmem:[#allocation4 + $0x168] sm:$0xff]  ;;  %v787_v11 = vpack.c.bf16 %v323_v10, %v322_v9  ;;  %v324_v12 = vld [vmem:[#allocation4 + $0x150] sm:$0xff] }
  0x35   :  { %v745_v26 = vpack.c.bf16 %v145_v25, %v144_v24  ;;  %v146_v27 = vld [vmem:[#allocation4 + $0x1c0] sm:$0xff]  ;;  %v766_v47 = vpack.c.bf16 %v234_v46, %v233_v45  ;;  %v235_v48 = vld [vmem:[#allocation4 + $0x188] sm:$0xff]  ;;  %v325_v13 = vld [vmem:[#allocation4 + $0x170] sm:$0xff] }
  0x36   :  { %v147_v28 = vld [vmem:[#allocation4 + $0x1e0] sm:$0xff]  ;;  %758 = vmatpush3.bf16.msra.mxu0 %v757_v38  ;;  %v236_v49 = vld [vmem:[#allocation4 + $0x1a8] sm:$0xff]  ;;  %v790_v14 = vpack.c.bf16 %v325_v13, %v324_v12  ;;  %v326_v15 = vld [vmem:[#allocation4 + $0x190] sm:$0xff] }
  0x37   :  { %737 = vmatpush3.bf16.msra.mxu1 %v736_v17  ;;  %v748_v29 = vpack.c.bf16 %v147_v28, %v146_v27  ;;  %759 = vmatprep.subr.bf16.mxu0 %v886_v0  ;;  %v769_v50 = vpack.c.bf16 %v236_v49, %v235_v48  ;;  %v237_v56 = vld [vmem:[#allocation4 + $0x1c8] sm:$0xff]  ;;  %v327_v16 = vld [vmem:[#allocation4 + $0x1b0] sm:$0xff]  ;;  %v501_v18 = vld [vmem:[#allocation2 + $0xb] ss:$0 sm:$0xff] }
  0x38   :  { %738 = vmatprep.subr.bf16.mxu1 %v886_v0  ;;  %v238_v57 = vld [vmem:[#allocation4 + $0x1e8] sm:$0xff]  ;;  %v793_v17 = vpack.c.bf16 %v327_v16, %v326_v15  ;;  %v329_v24 = vld [vmem:[#allocation4 + $0x1f0] sm:$0xff]  ;;  %v406_v27 = vld [vmem:[#allocation4 + $0x38] sm:$0xff] }
  0x39   :  { %v772_v58 = vpack.c.bf16 %v238_v57, %v237_v56  ;;  %v407_v28 = vld [vmem:[#allocation4 + $0x58] sm:$0xff] }
  0x3a   :  { %761 = vmatpush3.bf16.msra.mxu0 %v760_v41  ;;  %v408_v30 = vld [vmem:[#allocation4 + $0x78] sm:$0xff] }
  0x3b   :  { %740 = vmatpush3.bf16.msra.mxu1 %v739_v20  ;;  %762 = vmatprep.subr.bf16.mxu0 %v886_v0  ;;  %v802_v31 = vpack.c.bf16 %v408_v30, %v407_v28  ;;  %v409_v32 = vld [vmem:[#allocation4 + $0x98] sm:$0xff] }
  0x3c   :  { %741 = vmatprep.subr.bf16.mxu1 %v886_v0  ;;  %v410_v33 = vld [vmem:[#allocation4 + $0xb8] sm:$0xff] }
  0x3d   :  { %v805_v34 = vpack.c.bf16 %v410_v33, %v409_v32  ;;  %v412_v35 = vld [vmem:[#allocation4 + $0xf8] sm:$0xff] }
  0x3e   :  { %764 = vmatpush3.bf16.msra.mxu0 %v763_v44  ;;  %v413_v37 = vld [vmem:[#allocation4 + $0x118] sm:$0xff] }
  0x3f   :  { %743 = vmatpush3.bf16.msra.mxu1 %v742_v23  ;;  %765 = vmatprep.subr.bf16.mxu0 %v886_v0  ;;  %v328_v23 = vld [vmem:[#allocation4 + $0x1d0] sm:$0xff]  ;;  %v414_v38 = vld [vmem:[#allocation4 + $0x138] sm:$0xff] }
  0x40   :  { %744 = vmatprep.subr.bf16.mxu1 %v886_v0  ;;  %v796_v25 = vpack.c.bf16 %v329_v24, %v328_v23  ;;  %v811_v39 = vpack.c.bf16 %v414_v38, %v413_v37  ;;  %v415_v40 = vld [vmem:[#allocation4 + $0x158] sm:$0xff] }
  0x41   :  { %v416_v41 = vld [vmem:[#allocation4 + $0x178] sm:$0xff] }
  0x42   :  { %767 = vmatpush3.bf16.msra.mxu0 %v766_v47  ;;  %v814_v42 = vpack.c.bf16 %v416_v41, %v415_v40  ;;  %v417_v43 = vld [vmem:[#allocation4 + $0x198] sm:$0xff] }
  0x43   :  { %746 = vmatpush3.bf16.msra.mxu1 %v745_v26  ;;  %768 = vmatprep.subr.bf16.mxu0 %v886_v0  ;;  %v405_v26 = vld [vmem:[#allocation4 + $0x18] sm:$0xff] }
  0x44   :  { %747 = vmatprep.subr.bf16.mxu1 %v886_v0  ;;  %v418_v44 = vld [vmem:[#allocation4 + $0x1b8] sm:$0xff] }
  0x45   :  { %v817_v45 = vpack.c.bf16 %v418_v44, %v417_v43  ;;  %v502_v46 = vld [vmem:[#allocation2 + $0xc] ss:$0 sm:$0xff] }
  0x46   :  { %770 = vmatpush3.bf16.msra.mxu0 %v769_v50 }
  0x47   :  { %749 = vmatpush3.bf16.msra.mxu1 %v748_v29  ;;  %771 = vmatprep.subr.bf16.mxu0 %v886_v0  ;;  %v799_v29 = vpack.c.bf16 %v406_v27, %v405_v26 }
  0x48   :  { %774 = vmatprep.subr.bf16.mxu1 %v886_v0 }
  0x4a   :  { %773 = vmatpush3.bf16.msra.mxu0 %v772_v58 }
  0x4b   :  { %798 = vmatprep.subr.bf16.mxu0 %v886_v0 }
 0x100   :  { %v127_v52 = vpop.f32.mrb[0].mxu0 }
 0x101   :  { %v128_v53 = vadd.f32 %v498_v51, %v127_v52  ;;  %v581_v54 = vpop.f32.mrb[1].mxu0  ;;  %v419_v51 = vld [vmem:[#allocation4 + $0x1d8] sm:$0xff] }
 0x102   :  { %v420_v52 = vld [vmem:[#allocation4 + $0x1f8] sm:$0xff] }
 0x103   :  { %v131_v55 = vmax.f32 %v128_v53, 0.0  ;;  %v820_v53 = vpack.c.bf16 %v420_v52, %v419_v51  ;;  %v503_v54 = vld [vmem:[#allocation2 + $0xd] ss:$0 sm:$0xff] }
 0x105   :  { %615 = vmatmul.mubr.f32.vlgmr.msra.gmra.mrb[0].mxu1 %v131_v55 }
 0x106   :  { %684 = vmatprep.mubr.msk.f32.mxu1 %vm887_vm0, %v888_v1  ;;  %776 = vmatpush3.bf16.msra.mxu1 %v775_v62 }
 0x107   :  { %777 = vmatprep.subr.bf16.mxu1 %v886_v0 }
 0x10a   :  { %779 = vmatpush3.bf16.msra.mxu1 %v778_v2 }
 0x10b   :  { %780 = vmatprep.subr.bf16.mxu1 %v886_v0 }
 0x10e   :  { %782 = vmatpush3.bf16.msra.mxu1 %v781_v5 }
 0x10f   :  { %783 = vmatprep.subr.bf16.mxu1 %v886_v0 }
 0x112   :  { %785 = vmatpush3.bf16.msra.mxu1 %v784_v8 }
 0x113   :  { %786 = vmatprep.subr.bf16.mxu1 %v886_v0 }
 0x116   :  { %788 = vmatpush3.bf16.msra.mxu1 %v787_v11 }
 0x117   :  { %789 = vmatprep.subr.bf16.mxu1 %v886_v0 }
 0x11a   :  { %791 = vmatpush3.bf16.msra.mxu1 %v790_v14 }
 0x11b   :  { %792 = vmatprep.subr.bf16.mxu1 %v886_v0 }
 0x11e   :  { %794 = vmatpush3.bf16.msra.mxu1 %v793_v17 }
 0x11f   :  { %795 = vmatprep.subr.bf16.mxu1 %v886_v0 }
 0x122   :  { %797 = vmatpush3.bf16.msra.mxu1 %v796_v25 }
 0x1d8   :  { %v218_v19 = vpop.f32.mrb[0].mxu1 }
 0x1d9   :  { %v219_v20 = vadd.f32 %v501_v18, %v218_v19  ;;  %v616_v21 = vpop.f32.mrb[1].mxu1 }
 0x1db   :  { %v222_v22 = vmax.f32 %v219_v20, 0.0 }
 0x1dd   :  { %650 = vmatmul.mubr.f32.vlgmr.msra.gmra.mrb[2].mxu0 %v222_v22 }
 0x1de   :  { %719 = vmatprep.mubr.msk.f32.mxu0 %vm887_vm0, %v888_v1  ;;  %800 = vmatpush3.bf16.msra.mxu0 %v799_v29  ;;  %v411_v1 = vld [vmem:[#allocation4 + $0xd8] sm:$0xff] }
 0x1df   :  { %801 = vmatprep.subr.bf16.mxu0 %v886_v0  ;;  %v808_v36 = vpack.c.bf16 %v412_v35, %v411_v1 }
 0x1e2   :  { %803 = vmatpush3.bf16.msra.mxu0 %v802_v31 }
 0x1e3   :  { %804 = vmatprep.subr.bf16.mxu0 %v886_v0 }
 0x1e6   :  { %806 = vmatpush3.bf16.msra.mxu0 %v805_v34 }
 0x1e7   :  { %807 = vmatprep.subr.bf16.mxu0 %v886_v0 }
 0x1ea   :  { %809 = vmatpush3.bf16.msra.mxu0 %v808_v36 }
 0x1eb   :  { %810 = vmatprep.subr.bf16.mxu0 %v886_v0 }
 0x1ee   :  { %812 = vmatpush3.bf16.msra.mxu0 %v811_v39 }
 0x1ef   :  { %813 = vmatprep.subr.bf16.mxu0 %v886_v0 }
 0x1f2   :  { %815 = vmatpush3.bf16.msra.mxu0 %v814_v42 }
 0x1f3   :  { %816 = vmatprep.subr.bf16.mxu0 %v886_v0 }
 0x1f6   :  { %818 = vmatpush3.bf16.msra.mxu0 %v817_v45 }
 0x1f7   :  { %819 = vmatprep.subr.bf16.mxu0 %v886_v0 }
 0x1fa   :  { %821 = vmatpush3.bf16.msra.mxu0 %v820_v53 }
 0x2b0   :  { %v309_v47 = vpop.f32.mrb[2].mxu0 }
 0x2b1   :  { %v310_v48 = vadd.f32 %v502_v46, %v309_v47  ;;  %v651_v49 = vpop.f32.mrb[3].mxu0 }
 0x2b3   :  { %v313_v50 = vmax.f32 %v310_v48, 0.0 }
 0x2b5   :  { %685 = vmatmul.mubr.f32.vlgmr.msra.gmra.mrb[2].mxu1 %v313_v50 }
 0x388   :  { %v400_v55 = vpop.f32.mrb[2].mxu1 }
 0x389   :  { %v401_v56 = vadd.f32 %v503_v54, %v400_v55  ;;  %v686_v57 = vpop.f32.mrb[3].mxu1 }
 0x38b   :  { %v404_v58 = vmax.f32 %v401_v56, 0.0 }
 0x38d   :  { %720 = vmatmul.mubr.f32.vlgmr.msra.gmra.mrb[4].mxu0 %v404_v58 }
 0x460   :  { %v487_v59 = vpop.f32.mrb[4].mxu0 }
 0x461   :  { %491 = vst [vmem:[%s986_s3] sm:$0x3] %v487_v59  ;;  %v721_v0 = vpop.f32.mrb[5].mxu0 }
 0x462   :  { %496 = vsyncpa [#allocation3], 1 }
 0x463   :  { %497 = vsyncpa [#allocation5], 1 }

</bundles_post_ra>
